<compile_context>
chip_gen: v7x
topology: tpu7x:2x2x1
jax: 0.10.0
libtpu: 0.0.40
codegen_flags: <defaults>
</compile_context>

<pallas_src>
import functools

import jax
import jax.numpy as jnp
from jax import lax
from jax.experimental import pallas as pl
from jax.experimental.pallas import tpu as pltpu

_LANES = 128
_ACC_ROWS = 64      # accumulator block rows: 8 independent f32 vreg chains
_SUB_ROWS = 1024    # per-iteration sub-chunk; bounds in-kernel temporaries


def _round_up(x, m):
    return (x + m - 1) // m * m


@functools.lru_cache(maxsize=None)
def _chip_config():
    """Return (num_tensorcores, max_tile_rows, vmem_limit_bytes) for this chip."""
    try:
        kind = jax.local_devices()[0].device_kind.lower()
    except Exception:  # pragma: no cover - e.g. interpret mode / no devices yet
        kind = ""
    if "v7" in kind:
        # v7x: 2 TensorCores/chip, 64 MiB VMEM per core, ~3.2 TB/s HBM.
        return 2, 8192, 48 * 1024 * 1024
    if "v6" in kind or "v5" in kind or "v4" in kind:
        # Single TensorCore, 128 MiB physical VMEM -> raise the scoped limit.
        return 1, 8192, 64 * 1024 * 1024
    # Unknown chip: conservative tiles, keep the compiler's default VMEM limit.
    return 1, 2048, None


def _tiling(rows, ncores, max_tile_rows):
    """Pick (tile_rows, chunks_per_core); all static Python ints."""
    per_core = pl.cdiv(rows, ncores)
    tile_rows = _round_up(per_core, _ACC_ROWS)
    if tile_rows > _SUB_ROWS:
        tile_rows = _round_up(tile_rows, _SUB_ROWS)
    tile_rows = min(tile_rows, max_tile_rows)
    chunks = pl.cdiv(rows, ncores * tile_rows)
    return tile_rows, chunks


def _make_kernel(n_inputs, rows, tile_rows, chunks, need_mask):
    """Streaming partial-sum kernel: out[c] += fold((pred-tgt)^2[*w]) per step."""
    sub = min(_SUB_ROWS, tile_rows)
    nsub = tile_rows // sub
    assert sub % _ACC_ROWS == 0 and nsub * sub == tile_rows

    def kernel(*refs):
        in_refs, out_ref = refs[:-1], refs[-1]
        c = pl.program_id(0)           # core axis (size 1 except v7x)
        i = pl.program_id(1)           # reduction axis

        @pl.when(i == 0)
        def _():
            out_ref[...] = jnp.zeros_like(out_ref)

        # Logical (unclamped) first row of this block in the full array.
        block0 = (c * chunks + i) * tile_rows

        def sq_err(r0):
            p = in_refs[0][pl.ds(r0, sub), :].astype(jnp.float32)
            t = in_refs[1][pl.ds(r0, sub), :].astype(jnp.float32)
            d = p - t
            sq = d * d
            if n_inputs == 3:
                sq = sq * in_refs[2][pl.ds(r0, sub), :].astype(jnp.float32)
            return sq

        def accum(r0, row_off, masked):
            sq = sq_err(r0)
            if masked:
                row = lax.broadcasted_iota(jnp.int32, (sub, _LANES), 0)
                valid = rows - block0 - row_off      # may be <= 0 (fully OOB)
                sq = jnp.where(row < valid, sq, 0.0)
            # Fold (sub,128) -> (64,128) with pure VPU adds; final cross-lane
            # reduce happens once in the wrapper.
            out_ref[...] += sq.reshape(-1, _ACC_ROWS, _LANES).sum(axis=0)

        def run(masked):
            if nsub == 1:
                accum(0, 0, masked)
            else:
                def body(j, carry):
                    off = j * sub
                    accum(pl.multiple_of(off, sub), off, masked)
                    return carry
                lax.fori_loop(0, nsub, body, 0, unroll=True)

        if need_mask:
            is_full = block0 + tile_rows <= rows

            @pl.when(is_full)
            def _():
                run(masked=False)

            @pl.when(jnp.logical_not(is_full))
            def _():
                run(masked=True)
        else:
            run(masked=False)

    return kernel


def _flatten_2d(x):
    """Row-major flatten to (rows, 128) without copies when numel % 128 == 0."""
    flat = x.reshape(-1)
    rem = flat.shape[0] % _LANES
    if rem:
        # TODO(synk): numel % 128 != 0 still incurs one jnp.pad HBM copy; a
        # 1-D-block formulation with lane-level masking would remove it.
        flat = jnp.pad(flat, (0, _LANES - rem))
    return flat.reshape(-1, _LANES)


def _weighted_sq_err_sum(pred, target, weight):
    """sum((pred - target)^2 [* weight]) as f32 via a streaming Pallas reduction."""
    operands = [_flatten_2d(pred), _flatten_2d(target)]
    if weight is not None:
        operands.append(_flatten_2d(weight))
    n_inputs = len(operands)
    rows = operands[0].shape[0]

    ncores, max_tile_rows, vmem_limit = _chip_config()
    if rows < 4 * _ACC_ROWS:
        ncores = 1                      # tiny input: 2-core split is pure waste
    tile_rows, chunks = _tiling(rows, ncores, max_tile_rows)
    need_mask = (ncores * chunks * tile_rows) != rows
    last_block = pl.cdiv(rows, tile_rows) - 1

    # Clamp the block index so a fully out-of-range block (possible only for
    # the trailing core-1 blocks on v7x) still issues an in-bounds DMA; its
    # contribution is zeroed by the in-kernel row mask.
    def in_index_map(c, i):
        return (jnp.minimum(c * chunks + i, last_block), 0)

    in_spec = pl.BlockSpec((tile_rows, _LANES), in_index_map)
    kernel = _make_kernel(n_inputs, rows, tile_rows, chunks, need_mask)

    if ncores == 2:
        dim_sem = (pltpu.CORE_PARALLEL, pltpu.ARBITRARY)
    else:
        dim_sem = (pltpu.ARBITRARY, pltpu.ARBITRARY)

    out_rows = ncores * _ACC_ROWS
    numel = rows * _LANES
    in_bytes = sum(int(op.size) * op.dtype.itemsize for op in operands)
    cost = pl.CostEstimate(
        flops=(3 + (1 if n_inputs == 3 else 0)) * numel,
        transcendentals=0,
        bytes_accessed=in_bytes + out_rows * _LANES * 4,
    )

    partials = pl.pallas_call(
        kernel,
        out_shape=jax.ShapeDtypeStruct((out_rows, _LANES), jnp.float32),
        grid_spec=pltpu.PrefetchScalarGridSpec(
            num_scalar_prefetch=0,
            grid=(ncores, chunks),
            in_specs=[in_spec] * n_inputs,
            # Same block index across the reduction axis -> VMEM-resident
            # accumulator; one (64,128) block per core along the core axis.
            out_specs=pl.BlockSpec((_ACC_ROWS, _LANES), lambda c, i: (c, 0)),
        ),
        compiler_params=pltpu.CompilerParams(
            dimension_semantics=dim_sem,
            vmem_limit_bytes=vmem_limit),
        cost_estimate=cost,
    )(*operands)

    return jnp.sum(partials, dtype=jnp.float32)


@functools.partial(jax.jit, static_argnames=("has_weight", "has_avg_factor"))
def _mse_loss_mod_impl(pred, target, weight, avg_factor, loss_weight,
                       has_weight, has_avg_factor):
    w = jnp.broadcast_to(weight, pred.shape) if has_weight else None
    total = _weighted_sq_err_sum(pred, target, w)
    if has_avg_factor:
        denom = avg_factor.astype(jnp.float32)
    else:
        denom = jnp.float32(pred.size)              # reduction='mean'
    return (total / denom) * loss_weight.astype(jnp.float32)


class MSELossMod:
    """JAX/Pallas port of the PyTorch MSELossMod module (forward only)."""

    def __init__(self, loss_weight=1.0):
        self.loss_weight = float(loss_weight)

    def __call__(self, pred, target, weight=None, avg_factor=None):
        has_weight = weight is not None
        has_avg = avg_factor is not None
        w = jnp.asarray(weight) if has_weight else jnp.zeros((), jnp.float32)
        af = jnp.asarray(avg_factor, jnp.float32) if has_avg else jnp.float32(1.0)
        lw = jnp.float32(self.loss_weight)
        return _mse_loss_mod_impl(pred, target, w, af, lw,
                                  has_weight=has_weight, has_avg_factor=has_avg)


if __name__ == "__main__":
    key = jax.random.PRNGKey(0)
    k1, k2, k3, k4, k5, k6, k7 = jax.random.split(key, 7)

    # NCHW, small shapes
    N, C, H, W = 2, 4, 16, 16
    pred = jax.random.normal(k1, (N, C, H, W), dtype=jnp.float32)
    target = jax.random.normal(k2, (N, C, H, W), dtype=jnp.float32)
    weight = jax.random.uniform(k3, (N, C, H, W), dtype=jnp.float32)

    module = MSELossMod(loss_weight=2.0)

    # case 1: no weight, default mean reduction (2-input kernel path)
    loss1 = module(pred, target)
    # case 2: with weight and avg_factor (3-input kernel path)
    loss2 = module(pred, target, weight=weight, avg_factor=100.0)
    # case 3: weighted mean (no avg_factor)
    loss3 = module(pred, target, weight=weight)
    # case 4: ragged numel (not a multiple of 128) exercises the pad fallback
    p4 = jax.random.normal(k4, (3, 5, 7, 11), dtype=jnp.float32)
    t4 = jax.random.normal(k5, (3, 5, 7, 11), dtype=jnp.float32)
    loss4 = module(p4, t4)
    # case 5: bf16 inputs (in-kernel f32 cast)
    p5 = pred.astype(jnp.bfloat16)
    t5 = target.astype(jnp.bfloat16)
    loss5 = module(p5, t5)
    # case 6: multi-step grid (>8192 rows) exercises accumulation + sub-chunk
    # loop + masked final partial block
    p6 = jax.random.normal(k6, (2, 4, 384, 384), dtype=jnp.float32)
    t6 = jax.random.normal(k7, (2, 4, 384, 384), dtype=jnp.float32)
    loss6 = module(p6, t6)

    jax.block_until_ready((loss1, loss2, loss3, loss4, loss5, loss6))

    # sanity checks vs pure-JAX references
    ref1 = jnp.mean((pred - target) ** 2) * 2.0
    ref2 = jnp.sum((pred - target) ** 2 * weight) / 100.0 * 2.0
    ref3 = jnp.mean((pred - target) ** 2 * weight) * 2.0
    ref4 = jnp.mean((p4 - t4) ** 2) * 2.0
    ref5 = jnp.mean((p5.astype(jnp.float32) - t5.astype(jnp.float32)) ** 2) * 2.0
    ref6 = jnp.mean((p6 - t6) ** 2) * 2.0
    assert jnp.allclose(loss1, ref1, rtol=1e-5, atol=1e-6), (loss1, ref1)
    assert jnp.allclose(loss2, ref2, rtol=1e-5, atol=1e-6), (loss2, ref2)
    assert jnp.allclose(loss3, ref3, rtol=1e-5, atol=1e-6), (loss3, ref3)
    assert jnp.allclose(loss4, ref4, rtol=1e-5, atol=1e-6), (loss4, ref4)
    assert jnp.allclose(loss5, ref5, rtol=1e-4, atol=1e-5), (loss5, ref5)
    assert jnp.allclose(loss6, ref6, rtol=1e-4, atol=1e-6), (loss6, ref6)

    print("KERNEL_OK")
</pallas_src>

<mosaic_0001>
module attributes {stable_mosaic.version = 11 : i64} {
  func.func @kernel(%arg0: i32, %arg1: i32, %arg2: memref<64x128xf32, #tpu.memory_space<vmem>>, %arg3: memref<64x128xf32, #tpu.memory_space<vmem>>, %arg4: memref<64x128xf32, #tpu.memory_space<vmem>>) attributes {dimension_semantics = [#tpu.dimension_semantics<arbitrary>, #tpu.dimension_semantics<arbitrary>], iteration_bounds = array<i64: 1, 1>, scalar_prefetch = 0 : i64, scratch_operands = 0 : i64, tpu.core_type = #tpu.core_type<tc>, window_params = [{transform_indices = @transform_0, window_bounds = array<i64: 64, 128>}, {transform_indices = @transform_1, window_bounds = array<i64: 64, 128>}, {transform_indices = @transform_2, window_bounds = array<i64: 64, 128>}]} {
    %c0_i32 = arith.constant 0 : i32
    %0 = arith.cmpi eq, %arg1, %c0_i32 : i32
    %1 = arith.extui %0 : i1 to i32
    %c0_i32_0 = arith.constant 0 : i32
    %2 = arith.cmpi ne, %1, %c0_i32_0 : i32
    scf.if %2 {
      %cst = arith.constant 0.000000e+00 : f32
      %13 = vector.broadcast %cst : f32 to vector<64x128xf32>
      %c0 = arith.constant 0 : index
      %c0_4 = arith.constant 0 : index
      %14 = vector.load %arg4[%c0, %c0_4] : memref<64x128xf32, #tpu.memory_space<vmem>>, vector<64x128xf32>
      tpu.vector_store %arg4[%c0, %c0_4], %13 {strides = array<i32>} : memref<64x128xf32, #tpu.memory_space<vmem>>, vector<64x128xf32>,
    } else {
    }
    %c1_i32 = arith.constant 1 : i32
    %3 = arith.muli %arg0, %c1_i32 : i32
    %4 = arith.addi %3, %arg1 : i32
    %c64_i32 = arith.constant 64 : i32
    %5 = arith.muli %4, %c64_i32 : i32
    %c64_i32_1 = arith.constant 64 : i32
    %6 = arith.addi %5, %c64_i32_1 : i32
    %c16_i32 = arith.constant 16 : i32
    %7 = arith.cmpi sle, %6, %c16_i32 : i32
    %8 = arith.extui %7 : i1 to i32
    %c0_i32_2 = arith.constant 0 : i32
    %9 = arith.cmpi ne, %8, %c0_i32_2 : i32
    scf.if %9 {
      %c0 = arith.constant 0 : index
      %c0_4 = arith.constant 0 : index
      %13 = vector.load %arg2[%c0, %c0_4] : memref<64x128xf32, #tpu.memory_space<vmem>>, vector<64x128xf32>
      %c0_5 = arith.constant 0 : index
      %c0_6 = arith.constant 0 : index
      %14 = vector.load %arg3[%c0_5, %c0_6] : memref<64x128xf32, #tpu.memory_space<vmem>>, vector<64x128xf32>
      %15 = arith.subf %13, %14 : vector<64x128xf32>
      %16 = arith.mulf %15, %15 : vector<64x128xf32>
      %c0_7 = arith.constant 0 : index
      %c0_8 = arith.constant 0 : index
      %17 = vector.load %arg4[%c0_7, %c0_8] : memref<64x128xf32, #tpu.memory_space<vmem>>, vector<64x128xf32>
      %18 = vector.shape_cast %16 : vector<64x128xf32> to vector<1x64x128xf32>
      %cst = arith.constant dense<0.000000e+00> : vector<64x128xf32>
      %19 = vector.multi_reduction <add>, %18, %cst [0] : vector<1x64x128xf32> to vector<64x128xf32>
      %20 = arith.addf %17, %19 : vector<64x128xf32>
      %c0_9 = arith.constant 0 : index
      %c0_10 = arith.constant 0 : index
      %21 = vector.load %arg4[%c0_9, %c0_10] : memref<64x128xf32, #tpu.memory_space<vmem>>, vector<64x128xf32>
      tpu.vector_store %arg4[%c0_9, %c0_10], %20 {strides = array<i32>} : memref<64x128xf32, #tpu.memory_space<vmem>>, vector<64x128xf32>,
    } else {
    }
    %true = arith.constant true
    %10 = arith.xori %7, %true : i1
    %11 = arith.extui %10 : i1 to i32
    %c0_i32_3 = arith.constant 0 : i32
    %12 = arith.cmpi ne, %11, %c0_i32_3 : i32
    scf.if %12 {
      %c0 = arith.constant 0 : index
      %c0_4 = arith.constant 0 : index
      %13 = vector.load %arg2[%c0, %c0_4] : memref<64x128xf32, #tpu.memory_space<vmem>>, vector<64x128xf32>
      %c0_5 = arith.constant 0 : index
      %c0_6 = arith.constant 0 : index
      %14 = vector.load %arg3[%c0_5, %c0_6] : memref<64x128xf32, #tpu.memory_space<vmem>>, vector<64x128xf32>
      %15 = arith.subf %13, %14 : vector<64x128xf32>
      %16 = arith.mulf %15, %15 : vector<64x128xf32>
      %17 = tpu.iota {dimensions = array<i32: 0>} : vector<64x128xi32>
      %c16_i32_7 = arith.constant 16 : i32
      %18 = arith.subi %c16_i32_7, %5 : i32
      %c0_i32_8 = arith.constant 0 : i32
      %19 = arith.subi %18, %c0_i32_8 : i32
      %20 = vector.broadcast %19 : i32 to vector<64x128xi32>
      %21 = arith.cmpi slt, %17, %20 : vector<64x128xi32>
      %cst = arith.constant 0.000000e+00 : f32
      %22 = vector.broadcast %cst : f32 to vector<64x128xf32>
      %23 = arith.select %21, %16, %22 : vector<64x128xi1>, vector<64x128xf32>
      %c0_9 = arith.constant 0 : index
      %c0_10 = arith.constant 0 : index
      %24 = vector.load %arg4[%c0_9, %c0_10] : memref<64x128xf32, #tpu.memory_space<vmem>>, vector<64x128xf32>
      %25 = vector.shape_cast %23 : vector<64x128xf32> to vector<1x64x128xf32>
      %cst_11 = arith.constant dense<0.000000e+00> : vector<64x128xf32>
      %26 = vector.multi_reduction <add>, %25, %cst_11 [0] : vector<1x64x128xf32> to vector<64x128xf32>
      %27 = arith.addf %24, %26 : vector<64x128xf32>
      %c0_12 = arith.constant 0 : index
      %c0_13 = arith.constant 0 : index
      %28 = vector.load %arg4[%c0_12, %c0_13] : memref<64x128xf32, #tpu.memory_space<vmem>>, vector<64x128xf32>
      tpu.vector_store %arg4[%c0_12, %c0_13], %27 {strides = array<i32>} : memref<64x128xf32, #tpu.memory_space<vmem>>, vector<64x128xf32>,
    } else {
    }
    return
  }
  func.func @transform_0(%arg0: i32, %arg1: i32) -> (i32, i32) {
    %c1_i32 = arith.constant 1 : i32
    %0 = arith.muli %arg0, %c1_i32 : i32
    %1 = arith.addi %0, %arg1 : i32
    %c0_i32 = arith.constant 0 : i32
    %2 = arith.minsi %1, %c0_i32 : i32
    %c0_i32_0 = arith.constant 0 : i32
    %c0_i32_1 = arith.constant 0 : i32
    return %2, %c0_i32_0 : i32, i32
  }
  func.func @transform_1(%arg0: i32, %arg1: i32) -> (i32, i32) {
    %c1_i32 = arith.constant 1 : i32
    %0 = arith.muli %arg0, %c1_i32 : i32
    %1 = arith.addi %0, %arg1 : i32
    %c0_i32 = arith.constant 0 : i32
    %2 = arith.minsi %1, %c0_i32 : i32
    %c0_i32_0 = arith.constant 0 : i32
    %c0_i32_1 = arith.constant 0 : i32
    return %2, %c0_i32_0 : i32, i32
  }
  func.func @transform_2(%arg0: i32, %arg1: i32) -> (i32, i32) {
    %c0_i32 = arith.constant 0 : i32
    %c0_i32_0 = arith.constant 0 : i32
    return %arg0, %c0_i32 : i32, i32
  }
}

</mosaic_0001>

<bundles_post_ra>
// kernel: _mse_loss_mod_impl.1
= control target key start
LH: loop header
LB: loop body
LE: loop exit
PB: predicated region body
PF: predicated region fallthrough
CT: control target
= control target key end

     0   :  { %v290_v3 = vmov 0.0   ;;  %s342_s2 = inlined_call_operand.vmem [shape: f32[64,128], index: 2, kind: output, shape index: {}]   ;;  %s343_s0 = inlined_call_operand.vmem [shape: f32[16,128], index: 0, kind: input, shape index: {}]   ;;  %s344_s1 = inlined_call_operand.vmem [shape: f32[16,128], index: 1, kind: input, shape index: {}]  }
   0x1   :  { %v182_v0 = vld [vmem:[%s343_s0] sm:$0xff]  ;;  %v183_v2 = vld [vmem:[%s343_s0 + $0x8] sm:$0xff]  ;;  %267 = vst [vmem:[%s342_s2 + $0x10] sm:$0xff] %v290_v3  ;;  %268 = vst [vmem:[%s342_s2 + $0x18] sm:$0xff] %v290_v3 }
   0x2   :  { %v190_v1 = vld [vmem:[%s344_s1] sm:$0xff]  ;;  %269 = vst [vmem:[%s342_s2 + $0x20] sm:$0xff] %v290_v3  ;;  %270 = vst [vmem:[%s342_s2 + $0x28] sm:$0xff] %v290_v3  ;;  %v191_v5 = vld [vmem:[%s344_s1 + $0x8] sm:$0xff] }
   0x3   :  { %271 = vst [vmem:[%s342_s2 + $0x30] sm:$0xff] %v290_v3  ;;  %272 = vst [vmem:[%s342_s2 + $0x38] sm:$0xff] %v290_v3  ;;  %v198_v4 = vsub.f32 %v182_v0, %v190_v1  ;;  %v199_v6 = vsub.f32 %v183_v2, %v191_v5 }
   0x5   :  { %v206_v7 = vmul.f32 %v198_v4, %v198_v4  ;;  %v207_v8 = vmul.f32 %v199_v6, %v199_v6 }
   0x7   :  { %265 = vst [vmem:[%s342_s2] sm:$0xff] %v206_v7  ;;  %266 = vst [vmem:[%s342_s2 + $0x8] sm:$0xff] %v207_v8 }

</bundles_post_ra>
